<compile_context>
chip_gen: v6e
topology: v6e:2x2x1
jax: 0.10.0
libtpu: 0.0.40
codegen_flags: <defaults>
</compile_context>

<pallas_src>
import functools

import jax
import jax.numpy as jnp
from jax.experimental import pallas as pl
from jax.experimental.pallas import tpu as pltpu

_SUBLANE = 8
_LANE = 128


def _cdiv(a: int, b: int) -> int:
    return -(-a // b)


def _round_up(x: int, m: int) -> int:
    return ((x + m - 1) // m) * m


def _tpu_generation() -> int:
    """Best-effort chip-generation sniff (5 / 6 / 7); defaults to 6."""
    try:
        kind = jax.devices()[0].device_kind.lower()
    except Exception:  # pragma: no cover - non-TPU fallback
        return 6
    for g in (7, 6, 5, 4):
        if f"v{g}" in kind:
            return g
    return 6


def _hw_config():
    gen = _tpu_generation()
    if gen >= 7:
        # 64 MiB VMEM/TC: 3 inputs x 3 buffers x 4 MiB = 36 MiB + headroom.
        return dict(num_shards=2, tile_bytes=4 * 1024 * 1024, buffer_count=3,
                    vmem_limit=48 * 1024 * 1024)
    if gen == 6:
        # 128 MiB VMEM: 3 inputs x 2 buffers x 6 MiB = 36 MiB.
        return dict(num_shards=1, tile_bytes=6 * 1024 * 1024, buffer_count=2,
                    vmem_limit=80 * 1024 * 1024)
    # v5e (and older): single TC, keep per-buffer tile in the 2-4 MiB range.
    return dict(num_shards=1, tile_bytes=3 * 1024 * 1024, buffer_count=2,
                vmem_limit=48 * 1024 * 1024)


def _choose_tiling(n: int, d: int, itemsize: int, cfg):
    """Byte-budgeted tile rows (per input, per pipeline buffer)."""
    n_pad = _round_up(n, _SUBLANE)
    per_row = max(d * itemsize, 1)
    rows = max(_SUBLANE, cfg["tile_bytes"] // per_row)
    rows = min(rows, n_pad)
    tn = max(_SUBLANE, (rows // _SUBLANE) * _SUBLANE)

    num_shards = cfg["num_shards"]
    if num_shards > 1:
        if _cdiv(n_pad, tn) < num_shards:
            # Too little work to split across cores — drop the shard axis.
            num_shards = 1
        else:
            # Round the number of tiles up to a multiple of num_shards and
            # shrink tn accordingly, so no shard runs a clamped duplicate
            # tile (never increases the VMEM footprint).
            target = _round_up(_cdiv(n_pad, tn), num_shards)
            tn = max(_SUBLANE, _round_up(_cdiv(n_pad, target), _SUBLANE))

    num_tiles = _cdiv(n, tn)
    tiles_per_shard = _cdiv(num_tiles, num_shards)
    return int(tn), int(num_tiles), int(tiles_per_shard), int(num_shards)


def _scl_loss_kernel(a_ref, p_ref, n_ref, out_ref,
                     hl_ref, hc_ref, ol_ref, oc_ref, *,
                     temperature: float, tile_n: int, n_rows: int,
                     tiles_per_shard: int, sharded: bool):
    """Accumulates [hard_loss, hard_cnt, other_loss, other_cnt] per shard."""
    if sharded:
        s = pl.program_id(0)            # shard axis ("parallel")
        j = pl.program_id(1)            # tile axis ("arbitrary", reduction)
        last_j = pl.num_programs(1) - 1
    else:
        s = 0
        j = pl.program_id(0)
        last_j = pl.num_programs(0) - 1

    @pl.when(j == 0)
    def _():
        hl_ref[...] = jnp.zeros_like(hl_ref)
        hc_ref[...] = jnp.zeros_like(hc_ref)
        ol_ref[...] = jnp.zeros_like(ol_ref)
        oc_ref[...] = jnp.zeros_like(oc_ref)

    a = a_ref[...].astype(jnp.float32)
    p = p_ref[...].astype(jnp.float32)
    n = n_ref[...].astype(jnp.float32)

    # Row-wise reductions only; no normalized (TN, D) temporaries. Kept on
    # VPU/XLU on purpose (HBM-bound kernel; an N=1-column MXU matmul would
    # waste the array and add push/pop latency).
    aa = jnp.sum(a * a, axis=1, keepdims=True)     # (TN, 1)
    pp = jnp.sum(p * p, axis=1, keepdims=True)
    nn = jnp.sum(n * n, axis=1, keepdims=True)
    ap = jnp.sum(a * p, axis=1, keepdims=True)
    an = jnp.sum(a * n, axis=1, keepdims=True)

    # F.normalize(p=2, eps=1e-12): clamp the *squared* norm at 1e-24.
    inv_a = jax.lax.rsqrt(jnp.maximum(aa, 1e-24))
    inv_p = jax.lax.rsqrt(jnp.maximum(pp, 1e-24))
    inv_n = jax.lax.rsqrt(jnp.maximum(nn, 1e-24))

    pos = ap * (inv_a * inv_p)                     # (TN, 1) cosine sims
    neg = an * (inv_a * inv_n)

    # Mask rows past the true batch size (padded tail of the last tile and
    # any clamped duplicate tile on the sharded path).
    row = jax.lax.broadcasted_iota(jnp.int32, (tile_n, 1), 0)
    global_row = (s * tiles_per_shard + j) * tile_n + row
    valid = global_row < n_rows

    hard_mask = ((neg > pos) | (neg > 0.8)) & valid
    other_mask = (neg <= pos) & (neg <= 0.8) & valid

    # -log( exp(pos/T) / (exp(pos/T)+exp(neg/T)) ) == softplus((neg-pos)/T)
    # stable form: max(x,0) + log1p(exp(-|x|))  (no overflow for any T).
    x = (neg - pos) * (1.0 / temperature)
    term = jnp.maximum(x, 0.0) + jnp.log1p(jnp.exp(-jnp.abs(x)))

    hl_ref[...] = hl_ref[...] + jnp.sum(jnp.where(hard_mask, neg, 0.0),
                                        keepdims=True)
    hc_ref[...] = hc_ref[...] + jnp.sum(hard_mask.astype(jnp.float32),
                                        keepdims=True)
    ol_ref[...] = ol_ref[...] + jnp.sum(jnp.where(other_mask, term, 0.0),
                                        keepdims=True)
    oc_ref[...] = oc_ref[...] + jnp.sum(other_mask.astype(jnp.float32),
                                        keepdims=True)

    # Lane-dense (8,128) output slab, built only once per shard.
    @pl.when(j == last_j)
    def _():
        lane = jax.lax.broadcasted_iota(jnp.int32, (_SUBLANE, _LANE), 1)
        out_ref[0] = (jnp.where(lane == 0, hl_ref[...], 0.0)
                      + jnp.where(lane == 1, hc_ref[...], 0.0)
                      + jnp.where(lane == 2, ol_ref[...], 0.0)
                      + jnp.where(lane == 3, oc_ref[...], 0.0))


def selectively_contrastive_triplet_loss(anchor, positive, negative,
                                         anchor_label=None,
                                         positive_label=None,
                                         negative_label=None,
                                         *,
                                         temperature: float = 0.1,
                                         lam: float = 1.0):
    """Eval-mode forward of SelectivelyContrastiveTripletLoss."""
    del anchor_label, positive_label, negative_label   # unused in eval mode
    N, D = anchor.shape
    cfg = _hw_config()
    itemsize = jnp.dtype(anchor.dtype).itemsize
    tn, num_tiles, tiles_per_shard, num_shards = _choose_tiling(
        N, D, itemsize, cfg)
    sharded = num_shards > 1

    if sharded:
        grid = (num_shards, tiles_per_shard)

        def in_map(s, j):
            # Clamp so a shard's trailing (empty) tile never DMAs out of
            # bounds; such rows are masked in-kernel via the unclamped index.
            return (jnp.minimum(s * tiles_per_shard + j, num_tiles - 1), 0)

        out_map = lambda s, j: (s, 0, 0)
        dim_sem = ("parallel", "arbitrary")
    else:
        grid = (num_tiles,)
        in_map = lambda j: (j, 0)
        out_map = lambda j: (0, 0, 0)
        dim_sem = ("arbitrary",)

    in_spec = pl.BlockSpec((tn, D), in_map)
    if cfg["buffer_count"] != 2 and hasattr(pl, "Buffered"):
        try:
            in_spec = pl.BlockSpec(
                (tn, D), in_map, pipeline_mode=pl.Buffered(cfg["buffer_count"]))
        except TypeError:
            in_spec = pl.BlockSpec((tn, D), in_map)

    out_spec = pl.BlockSpec((1, _SUBLANE, _LANE), out_map)

    kernel = functools.partial(
        _scl_loss_kernel, temperature=float(temperature), tile_n=tn,
        n_rows=N, tiles_per_shard=tiles_per_shard, sharded=sharded)

    acc = pl.pallas_call(
        kernel,
        grid=grid,
        in_specs=[in_spec, in_spec, in_spec],
        out_specs=out_spec,
        out_shape=jax.ShapeDtypeStruct((num_shards, _SUBLANE, _LANE),
                                       jnp.float32),
        scratch_shapes=[pltpu.VMEM((1, 1), jnp.float32) for _ in range(4)],
        compiler_params=pltpu.CompilerParams(
            dimension_semantics=dim_sem,
            vmem_limit_bytes=cfg["vmem_limit"]),
    )(anchor, positive, negative)

    sums = jnp.sum(acc[:, 0, :4], axis=0)          # combine shard partials
    hard_loss, hard_cnt = sums[0], sums[1]
    other_loss, other_cnt = sums[2], sums[3]

    # NaN / empty-mask fallbacks (mirrors the torch scalar conditionals).
    hard_loss = jnp.where(jnp.isnan(hard_loss) | (hard_cnt == 0), 0.0, hard_loss)
    other_loss = jnp.where(jnp.isnan(other_loss) | (other_cnt == 0), 0.0,
                           other_loss)

    total_valid = hard_cnt + other_cnt
    total_valid = jnp.where(total_valid == 0, 1.0, total_valid)

    return (other_loss + lam * hard_loss) / total_valid


def _reference_loss(anchor, positive, negative, temperature=0.1, lam=1.0):
    """Pure-JAX reference of the eval-mode forward, for a sanity check."""
    def l2norm(x):
        return x / jnp.maximum(jnp.linalg.norm(x, axis=1, keepdims=True), 1e-12)
    a, p, n = l2norm(anchor), l2norm(positive), l2norm(negative)
    pos = jnp.diag(a @ p.T)
    neg = jnp.diag(a @ n.T)
    hard_mask = (neg > pos) | (neg > 0.8)
    hard_loss = jnp.sum(jnp.where(hard_mask, neg, 0.0))
    hard_cnt = jnp.sum(hard_mask)
    other_mask = (neg <= pos) & (neg <= 0.8)
    sm = jnp.exp(pos / temperature) / (jnp.exp(pos / temperature)
                                       + jnp.exp(neg / temperature))
    other_loss = jnp.sum(jnp.where(other_mask, -jnp.log(sm), 0.0))
    other_cnt = jnp.sum(other_mask)
    hard_loss = jnp.where(hard_cnt == 0, 0.0, hard_loss)
    other_loss = jnp.where(other_cnt == 0, 0.0, other_loss)
    total = jnp.maximum(hard_cnt + other_cnt, 1)
    return (other_loss + lam * hard_loss) / total


if __name__ == "__main__":
    key = jax.random.PRNGKey(0)

    def run_case(n, d, dtype, rtol, atol):
        k_a, k_p, k_n = jax.random.split(jax.random.fold_in(key, n * 1000 + d), 3)
        anchor = jax.random.normal(k_a, (n, d), dtype=jnp.float32).astype(dtype)
        positive = jax.random.normal(k_p, (n, d), dtype=jnp.float32).astype(dtype)
        negative = jax.random.normal(k_n, (n, d), dtype=jnp.float32).astype(dtype)
        # labels are unused in the eval-mode path but built for signature parity
        labels = jnp.arange(n, dtype=jnp.int32)

        loss = selectively_contrastive_triplet_loss(
            anchor, positive, negative, labels, labels, labels + 1,
            temperature=0.1, lam=1.0)
        loss = jax.block_until_ready(loss)

        ref = jax.block_until_ready(_reference_loss(
            anchor.astype(jnp.float32), positive.astype(jnp.float32),
            negative.astype(jnp.float32)))
        assert jnp.allclose(loss, ref, rtol=rtol, atol=atol), (dtype, loss, ref)

    run_case(8, 32, jnp.float32, 1e-4, 1e-5)
    # lane-padding check: D not a multiple of 128, sub-32-bit input dtype.
    run_case(16, 96, jnp.bfloat16, 5e-3, 1e-4)

    print("KERNEL_OK")
</pallas_src>

<mosaic_0001>
module attributes {stable_mosaic.version = 11 : i64} {
  func.func @_scl_loss_kernel(%arg0: i32, %arg1: memref<8x32xf32, #tpu.memory_space<vmem>>, %arg2: memref<8x32xf32, #tpu.memory_space<vmem>>, %arg3: memref<8x32xf32, #tpu.memory_space<vmem>>, %arg4: memref<1x8x128xf32, #tpu.memory_space<vmem>>, %arg5: memref<1x1xf32, #tpu.memory_space<vmem>>, %arg6: memref<1x1xf32, #tpu.memory_space<vmem>>, %arg7: memref<1x1xf32, #tpu.memory_space<vmem>>, %arg8: memref<1x1xf32, #tpu.memory_space<vmem>>) attributes {dimension_semantics = [#tpu.dimension_semantics<arbitrary>], iteration_bounds = array<i64: 1>, scalar_prefetch = 0 : i64, scratch_operands = 4 : i64, tpu.core_type = #tpu.core_type<tc>, window_params = [{transform_indices = @transform_0, window_bounds = array<i64: 8, 32>}, {transform_indices = @transform_1, window_bounds = array<i64: 8, 32>}, {transform_indices = @transform_2, window_bounds = array<i64: 8, 32>}, {pipeline_mode = #tpu.pipeline_mode<synchronous>, transform_indices = @transform_3, window_bounds = array<i64: 1, 8, 128>}]} {
    %c0_i32 = arith.constant 0 : i32
    %0 = arith.cmpi eq, %arg0, %c0_i32 : i32
    %1 = arith.extui %0 : i1 to i32
    %c0_i32_0 = arith.constant 0 : i32
    %2 = arith.cmpi ne, %1, %c0_i32_0 : i32
    scf.if %2 {
      %cst_44 = arith.constant 0.000000e+00 : f32
      %105 = vector.broadcast %cst_44 : f32 to vector<1x1xf32>
      %c0_45 = arith.constant 0 : index
      %c0_46 = arith.constant 0 : index
      %106 = vector.load %arg5[%c0_45, %c0_46] : memref<1x1xf32, #tpu.memory_space<vmem>>, vector<1x1xf32>
      tpu.vector_store %arg5[%c0_45, %c0_46], %105 {strides = array<i32>} : memref<1x1xf32, #tpu.memory_space<vmem>>, vector<1x1xf32>,
      %cst_47 = arith.constant 0.000000e+00 : f32
      %107 = vector.broadcast %cst_47 : f32 to vector<1x1xf32>
      %c0_48 = arith.constant 0 : index
      %c0_49 = arith.constant 0 : index
      %108 = vector.load %arg6[%c0_48, %c0_49] : memref<1x1xf32, #tpu.memory_space<vmem>>, vector<1x1xf32>
      tpu.vector_store %arg6[%c0_48, %c0_49], %107 {strides = array<i32>} : memref<1x1xf32, #tpu.memory_space<vmem>>, vector<1x1xf32>,
      %cst_50 = arith.constant 0.000000e+00 : f32
      %109 = vector.broadcast %cst_50 : f32 to vector<1x1xf32>
      %c0_51 = arith.constant 0 : index
      %c0_52 = arith.constant 0 : index
      %110 = vector.load %arg7[%c0_51, %c0_52] : memref<1x1xf32, #tpu.memory_space<vmem>>, vector<1x1xf32>
      tpu.vector_store %arg7[%c0_51, %c0_52], %109 {strides = array<i32>} : memref<1x1xf32, #tpu.memory_space<vmem>>, vector<1x1xf32>,
      %cst_53 = arith.constant 0.000000e+00 : f32
      %111 = vector.broadcast %cst_53 : f32 to vector<1x1xf32>
      %c0_54 = arith.constant 0 : index
      %c0_55 = arith.constant 0 : index
      %112 = vector.load %arg8[%c0_54, %c0_55] : memref<1x1xf32, #tpu.memory_space<vmem>>, vector<1x1xf32>
      tpu.vector_store %arg8[%c0_54, %c0_55], %111 {strides = array<i32>} : memref<1x1xf32, #tpu.memory_space<vmem>>, vector<1x1xf32>,
    } else {
    }
    %c0 = arith.constant 0 : index
    %c0_1 = arith.constant 0 : index
    %3 = vector.load %arg1[%c0, %c0_1] : memref<8x32xf32, #tpu.memory_space<vmem>>, vector<8x32xf32>
    %c0_2 = arith.constant 0 : index
    %c0_3 = arith.constant 0 : index
    %4 = vector.load %arg2[%c0_2, %c0_3] : memref<8x32xf32, #tpu.memory_space<vmem>>, vector<8x32xf32>
    %c0_4 = arith.constant 0 : index
    %c0_5 = arith.constant 0 : index
    %5 = vector.load %arg3[%c0_4, %c0_5] : memref<8x32xf32, #tpu.memory_space<vmem>>, vector<8x32xf32>
    %6 = arith.mulf %3, %3 : vector<8x32xf32>
    %cst = arith.constant dense<0.000000e+00> : vector<8xf32>
    %7 = vector.multi_reduction <add>, %6, %cst [1] : vector<8x32xf32> to vector<8xf32>
    %8 = vector.shape_cast %7 : vector<8xf32> to vector<8x1xf32>
    %9 = arith.mulf %4, %4 : vector<8x32xf32>
    %cst_6 = arith.constant dense<0.000000e+00> : vector<8xf32>
    %10 = vector.multi_reduction <add>, %9, %cst_6 [1] : vector<8x32xf32> to vector<8xf32>
    %11 = vector.shape_cast %10 : vector<8xf32> to vector<8x1xf32>
    %12 = arith.mulf %5, %5 : vector<8x32xf32>
    %cst_7 = arith.constant dense<0.000000e+00> : vector<8xf32>
    %13 = vector.multi_reduction <add>, %12, %cst_7 [1] : vector<8x32xf32> to vector<8xf32>
    %14 = vector.shape_cast %13 : vector<8xf32> to vector<8x1xf32>
    %15 = arith.mulf %3, %4 : vector<8x32xf32>
    %cst_8 = arith.constant dense<0.000000e+00> : vector<8xf32>
    %16 = vector.multi_reduction <add>, %15, %cst_8 [1] : vector<8x32xf32> to vector<8xf32>
    %17 = vector.shape_cast %16 : vector<8xf32> to vector<8x1xf32>
    %18 = arith.mulf %3, %5 : vector<8x32xf32>
    %cst_9 = arith.constant dense<0.000000e+00> : vector<8xf32>
    %19 = vector.multi_reduction <add>, %18, %cst_9 [1] : vector<8x32xf32> to vector<8xf32>
    %20 = vector.shape_cast %19 : vector<8xf32> to vector<8x1xf32>
    %cst_10 = arith.constant 1.000000e-24 : f32
    %21 = vector.broadcast %cst_10 : f32 to vector<8x1xf32>
    %22 = arith.maximumf %8, %21 : vector<8x1xf32>
    %23 = math.rsqrt %22 : vector<8x1xf32>
    %cst_11 = arith.constant 1.000000e-24 : f32
    %24 = vector.broadcast %cst_11 : f32 to vector<8x1xf32>
    %25 = arith.maximumf %11, %24 : vector<8x1xf32>
    %26 = math.rsqrt %25 : vector<8x1xf32>
    %cst_12 = arith.constant 1.000000e-24 : f32
    %27 = vector.broadcast %cst_12 : f32 to vector<8x1xf32>
    %28 = arith.maximumf %14, %27 : vector<8x1xf32>
    %29 = math.rsqrt %28 : vector<8x1xf32>
    %30 = arith.mulf %23, %26 : vector<8x1xf32>
    %31 = arith.mulf %17, %30 : vector<8x1xf32>
    %32 = arith.mulf %23, %29 : vector<8x1xf32>
    %33 = arith.mulf %20, %32 : vector<8x1xf32>
    %34 = tpu.iota {dimensions = array<i32: 0>} : vector<8x1xi32>
    %c0_i32_13 = arith.constant 0 : i32
    %35 = arith.addi %c0_i32_13, %arg0 : i32
    %c8_i32 = arith.constant 8 : i32
    %36 = arith.muli %35, %c8_i32 : i32
    %37 = vector.broadcast %36 : i32 to vector<8x1xi32>
    %38 = arith.addi %37, %34 : vector<8x1xi32>
    %c8_i32_14 = arith.constant 8 : i32
    %39 = vector.broadcast %c8_i32_14 : i32 to vector<8x1xi32>
    %40 = arith.cmpi slt, %38, %39 : vector<8x1xi32>
    %41 = arith.cmpf ogt, %33, %31 : vector<8x1xf32>
    %cst_15 = arith.constant 8.000000e-01 : f32
    %42 = vector.broadcast %cst_15 : f32 to vector<8x1xf32>
    %43 = arith.cmpf ogt, %33, %42 : vector<8x1xf32>
    %44 = arith.ori %41, %43 : vector<8x1xi1>
    %45 = arith.andi %44, %40 : vector<8x1xi1>
    %46 = arith.cmpf ole, %33, %31 : vector<8x1xf32>
    %cst_16 = arith.constant 8.000000e-01 : f32
    %47 = vector.broadcast %cst_16 : f32 to vector<8x1xf32>
    %48 = arith.cmpf ole, %33, %47 : vector<8x1xf32>
    %49 = arith.andi %46, %48 : vector<8x1xi1>
    %50 = arith.andi %49, %40 : vector<8x1xi1>
    %51 = arith.subf %33, %31 : vector<8x1xf32>
    %cst_17 = arith.constant 1.000000e+01 : f32
    %52 = vector.broadcast %cst_17 : f32 to vector<8x1xf32>
    %53 = arith.mulf %51, %52 : vector<8x1xf32>
    %cst_18 = arith.constant 0.000000e+00 : f32
    %54 = vector.broadcast %cst_18 : f32 to vector<8x1xf32>
    %55 = arith.maximumf %53, %54 : vector<8x1xf32>
    %56 = math.absf %53 : vector<8x1xf32>
    %cst_19 = arith.constant 0.000000e+00 : f32
    %57 = vector.broadcast %cst_19 : f32 to vector<8x1xf32>
    %58 = arith.subf %57, %56 : vector<8x1xf32>
    %59 = math.exp %58 : vector<8x1xf32>
    %60 = math.log1p %59 : vector<8x1xf32>
    %61 = arith.addf %55, %60 : vector<8x1xf32>
    %c0_20 = arith.constant 0 : index
    %c0_21 = arith.constant 0 : index
    %62 = vector.load %arg5[%c0_20, %c0_21] : memref<1x1xf32, #tpu.memory_space<vmem>>, vector<1x1xf32>
    %cst_22 = arith.constant 0.000000e+00 : f32
    %63 = vector.broadcast %cst_22 : f32 to vector<8x1xf32>
    %64 = arith.select %45, %33, %63 : vector<8x1xi1>, vector<8x1xf32>
    %65 = vector.shape_cast %64 : vector<8x1xf32> to vector<1x8x1xf32>
    %cst_23 = arith.constant dense<0.000000e+00> : vector<1xf32>
    %66 = vector.multi_reduction <add>, %65, %cst_23 [1, 2] : vector<1x8x1xf32> to vector<1xf32>
    %67 = vector.shape_cast %66 : vector<1xf32> to vector<1x1x1xf32>
    %68 = vector.extract %67[0, 0, 0] : f32 from vector<1x1x1xf32>
    %69 = vector.broadcast %68 : f32 to vector<1x1xf32>
    %70 = arith.addf %62, %69 : vector<1x1xf32>
    %c0_24 = arith.constant 0 : index
    %c0_25 = arith.constant 0 : index
    %71 = vector.load %arg5[%c0_24, %c0_25] : memref<1x1xf32, #tpu.memory_space<vmem>>, vector<1x1xf32>
    tpu.vector_store %arg5[%c0_24, %c0_25], %70 {strides = array<i32>} : memref<1x1xf32, #tpu.memory_space<vmem>>, vector<1x1xf32>,
    %c0_26 = arith.constant 0 : index
    %c0_27 = arith.constant 0 : index
    %72 = vector.load %arg6[%c0_26, %c0_27] : memref<1x1xf32, #tpu.memory_space<vmem>>, vector<1x1xf32>
    %73 = arith.extui %45 : vector<8x1xi1> to vector<8x1xi32>
    %74 = arith.sitofp %73 : vector<8x1xi32> to vector<8x1xf32>
    %75 = vector.shape_cast %74 : vector<8x1xf32> to vector<1x8x1xf32>
    %cst_28 = arith.constant dense<0.000000e+00> : vector<1xf32>
    %76 = vector.multi_reduction <add>, %75, %cst_28 [1, 2] : vector<1x8x1xf32> to vector<1xf32>
    %77 = vector.shape_cast %76 : vector<1xf32> to vector<1x1x1xf32>
    %78 = vector.extract %77[0, 0, 0] : f32 from vector<1x1x1xf32>
    %79 = vector.broadcast %78 : f32 to vector<1x1xf32>
    %80 = arith.addf %72, %79 : vector<1x1xf32>
    %c0_29 = arith.constant 0 : index
    %c0_30 = arith.constant 0 : index
    %81 = vector.load %arg6[%c0_29, %c0_30] : memref<1x1xf32, #tpu.memory_space<vmem>>, vector<1x1xf32>
    tpu.vector_store %arg6[%c0_29, %c0_30], %80 {strides = array<i32>} : memref<1x1xf32, #tpu.memory_space<vmem>>, vector<1x1xf32>,
    %c0_31 = arith.constant 0 : index
    %c0_32 = arith.constant 0 : index
    %82 = vector.load %arg7[%c0_31, %c0_32] : memref<1x1xf32, #tpu.memory_space<vmem>>, vector<1x1xf32>
    %cst_33 = arith.constant 0.000000e+00 : f32
    %83 = vector.broadcast %cst_33 : f32 to vector<8x1xf32>
    %84 = arith.select %50, %61, %83 : vector<8x1xi1>, vector<8x1xf32>
    %85 = vector.shape_cast %84 : vector<8x1xf32> to vector<1x8x1xf32>
    %cst_34 = arith.constant dense<0.000000e+00> : vector<1xf32>
    %86 = vector.multi_reduction <add>, %85, %cst_34 [1, 2] : vector<1x8x1xf32> to vector<1xf32>
    %87 = vector.shape_cast %86 : vector<1xf32> to vector<1x1x1xf32>
    %88 = vector.extract %87[0, 0, 0] : f32 from vector<1x1x1xf32>
    %89 = vector.broadcast %88 : f32 to vector<1x1xf32>
    %90 = arith.addf %82, %89 : vector<1x1xf32>
    %c0_35 = arith.constant 0 : index
    %c0_36 = arith.constant 0 : index
    %91 = vector.load %arg7[%c0_35, %c0_36] : memref<1x1xf32, #tpu.memory_space<vmem>>, vector<1x1xf32>
    tpu.vector_store %arg7[%c0_35, %c0_36], %90 {strides = array<i32>} : memref<1x1xf32, #tpu.memory_space<vmem>>, vector<1x1xf32>,
    %c0_37 = arith.constant 0 : index
    %c0_38 = arith.constant 0 : index
    %92 = vector.load %arg8[%c0_37, %c0_38] : memref<1x1xf32, #tpu.memory_space<vmem>>, vector<1x1xf32>
    %93 = arith.extui %50 : vector<8x1xi1> to vector<8x1xi32>
    %94 = arith.sitofp %93 : vector<8x1xi32> to vector<8x1xf32>
    %95 = vector.shape_cast %94 : vector<8x1xf32> to vector<1x8x1xf32>
    %cst_39 = arith.constant dense<0.000000e+00> : vector<1xf32>
    %96 = vector.multi_reduction <add>, %95, %cst_39 [1, 2] : vector<1x8x1xf32> to vector<1xf32>
    %97 = vector.shape_cast %96 : vector<1xf32> to vector<1x1x1xf32>
    %98 = vector.extract %97[0, 0, 0] : f32 from vector<1x1x1xf32>
    %99 = vector.broadcast %98 : f32 to vector<1x1xf32>
    %100 = arith.addf %92, %99 : vector<1x1xf32>
    %c0_40 = arith.constant 0 : index
    %c0_41 = arith.constant 0 : index
    %101 = vector.load %arg8[%c0_40, %c0_41] : memref<1x1xf32, #tpu.memory_space<vmem>>, vector<1x1xf32>
    tpu.vector_store %arg8[%c0_40, %c0_41], %100 {strides = array<i32>} : memref<1x1xf32, #tpu.memory_space<vmem>>, vector<1x1xf32>,
    %c0_i32_42 = arith.constant 0 : i32
    %102 = arith.cmpi eq, %arg0, %c0_i32_42 : i32
    %103 = arith.extui %102 : i1 to i32
    %c0_i32_43 = arith.constant 0 : i32
    %104 = arith.cmpi ne, %103, %c0_i32_43 : i32
    scf.if %104 {
      %105 = tpu.iota {dimensions = array<i32: 1>} : vector<8x128xi32>
      %c0_i32_44 = arith.constant 0 : i32
      %106 = vector.broadcast %c0_i32_44 : i32 to vector<8x128xi32>
      %107 = arith.cmpi eq, %105, %106 : vector<8x128xi32>
      %c0_45 = arith.constant 0 : index
      %c0_46 = arith.constant 0 : index
      %108 = vector.load %arg5[%c0_45, %c0_46] : memref<1x1xf32, #tpu.memory_space<vmem>>, vector<1x1xf32>
      %cst_47 = arith.constant 0.000000e+00 : f32
      %109 = vector.shape_cast %108 : vector<1x1xf32> to vector<1x1xf32>
      %110 = vector.broadcast %109 : vector<1x1xf32> to vector<8x128xf32>
      %111 = vector.broadcast %cst_47 : f32 to vector<8x128xf32>
      %112 = arith.select %107, %110, %111 : vector<8x128xi1>, vector<8x128xf32>
      %c1_i32 = arith.constant 1 : i32
      %113 = vector.broadcast %c1_i32 : i32 to vector<8x128xi32>
      %114 = arith.cmpi eq, %105, %113 : vector<8x128xi32>
      %c0_48 = arith.constant 0 : index
      %c0_49 = arith.constant 0 : index
      %115 = vector.load %arg6[%c0_48, %c0_49] : memref<1x1xf32, #tpu.memory_space<vmem>>, vector<1x1xf32>
      %cst_50 = arith.constant 0.000000e+00 : f32
      %116 = vector.shape_cast %115 : vector<1x1xf32> to vector<1x1xf32>
      %117 = vector.broadcast %116 : vector<1x1xf32> to vector<8x128xf32>
      %118 = vector.broadcast %cst_50 : f32 to vector<8x128xf32>
      %119 = arith.select %114, %117, %118 : vector<8x128xi1>, vector<8x128xf32>
      %120 = arith.addf %112, %119 : vector<8x128xf32>
      %c2_i32 = arith.constant 2 : i32
      %121 = vector.broadcast %c2_i32 : i32 to vector<8x128xi32>
      %122 = arith.cmpi eq, %105, %121 : vector<8x128xi32>
      %c0_51 = arith.constant 0 : index
      %c0_52 = arith.constant 0 : index
      %123 = vector.load %arg7[%c0_51, %c0_52] : memref<1x1xf32, #tpu.memory_space<vmem>>, vector<1x1xf32>
      %cst_53 = arith.constant 0.000000e+00 : f32
      %124 = vector.shape_cast %123 : vector<1x1xf32> to vector<1x1xf32>
      %125 = vector.broadcast %124 : vector<1x1xf32> to vector<8x128xf32>
      %126 = vector.broadcast %cst_53 : f32 to vector<8x128xf32>
      %127 = arith.select %122, %125, %126 : vector<8x128xi1>, vector<8x128xf32>
      %128 = arith.addf %120, %127 : vector<8x128xf32>
      %c3_i32 = arith.constant 3 : i32
      %129 = vector.broadcast %c3_i32 : i32 to vector<8x128xi32>
      %130 = arith.cmpi eq, %105, %129 : vector<8x128xi32>
      %c0_54 = arith.constant 0 : index
      %c0_55 = arith.constant 0 : index
      %131 = vector.load %arg8[%c0_54, %c0_55] : memref<1x1xf32, #tpu.memory_space<vmem>>, vector<1x1xf32>
      %cst_56 = arith.constant 0.000000e+00 : f32
      %132 = vector.shape_cast %131 : vector<1x1xf32> to vector<1x1xf32>
      %133 = vector.broadcast %132 : vector<1x1xf32> to vector<8x128xf32>
      %134 = vector.broadcast %cst_56 : f32 to vector<8x128xf32>
      %135 = arith.select %130, %133, %134 : vector<8x128xi1>, vector<8x128xf32>
      %136 = arith.addf %128, %135 : vector<8x128xf32>
      %c0_57 = arith.constant 0 : index
      %c0_58 = arith.constant 0 : index
      %c0_59 = arith.constant 0 : index
      %137 = vector.load %arg4[%c0_57, %c0_58, %c0_59] : memref<1x8x128xf32, #tpu.memory_space<vmem>>, vector<1x8x128xf32>
      %138 = vector.shape_cast %137 : vector<1x8x128xf32> to vector<8x128xf32>
      %139 = vector.shape_cast %136 : vector<8x128xf32> to vector<1x8x128xf32>
      tpu.vector_store %arg4[%c0_57, %c0_58, %c0_59], %139 {strides = array<i32>} : memref<1x8x128xf32, #tpu.memory_space<vmem>>, vector<1x8x128xf32>,
    } else {
    }
    return
  }
  func.func @transform_0(%arg0: i32) -> (i32, i32) {
    %c0_i32 = arith.constant 0 : i32
    %c0_i32_0 = arith.constant 0 : i32
    return %arg0, %c0_i32 : i32, i32
  }
  func.func @transform_1(%arg0: i32) -> (i32, i32) {
    %c0_i32 = arith.constant 0 : i32
    %c0_i32_0 = arith.constant 0 : i32
    return %arg0, %c0_i32 : i32, i32
  }
  func.func @transform_2(%arg0: i32) -> (i32, i32) {
    %c0_i32 = arith.constant 0 : i32
    %c0_i32_0 = arith.constant 0 : i32
    return %arg0, %c0_i32 : i32, i32
  }
  func.func @transform_3(%arg0: i32) -> (i32, i32, i32) {
    %c0_i32 = arith.constant 0 : i32
    %c0_i32_0 = arith.constant 0 : i32
    %c0_i32_1 = arith.constant 0 : i32
    %c0_i32_2 = arith.constant 0 : i32
    return %c0_i32, %c0_i32_0, %c0_i32_1 : i32, i32, i32
  }
}

</mosaic_0001>

<bundles_post_ra>
// kernel: tpu_custom_call.1
= control target key start
LH: loop header
LB: loop body
LE: loop exit
PB: predicated region body
PF: predicated region fallthrough
CT: control target
= control target key end

     0   :  { %8 = vsyncpa [#allocation7], 0  ;;  %s442_s0 = inlined_call_operand.hbm [shape: f32[8,32], index: 0, kind: input, shape index: {}]   ;;  %s443_s1 = inlined_call_operand.hbm [shape: f32[8,32], index: 1, kind: input, shape index: {}]   ;;  %s444_s2 = inlined_call_operand.hbm [shape: f32[8,32], index: 2, kind: input, shape index: {}]   ;;  %s445_s3 = inlined_call_operand.hbm [shape: f32[1,8,128], index: 3, kind: output, shape index: {}]  }
   0x1   :  { %9 = vsyncpa [#allocation10], 0 }
   0x2   :  { %10 = vsyncpa [#allocation8], 0  ;;  %s379_s12 = smov [#allocation9]   ;;  %s380_s14 = smov [#allocation6]  }
   0x3   :  { %s27_s13 = sshll.u32 %s379_s12, 4  ;;  %s17_s15 = sshll.u32 %s380_s14, 4  ;;  %s28_s13 = int_to_ptr.vmem [resolvable:$true] %s27_s13  ;;  %s18_s15 = int_to_ptr.vmem [resolvable:$true] %s17_s15 }
   0x4   :  { %s301_s16 = scalar_lea.vmem %s28_s13, 128  ;;  %p306_p1 = scmp.lt.s32.totalorder %s28_s13, %s28_s13 }
   0x5   :  { %p302_p0 = scmp.ne.s32.totalorder %s28_s13, %s301_s16  ;;  %p307_p2 = scmp.lt.s32.totalorder %s301_s16, %s301_s16 }
   0x7   :  { %p308_p3 = por %p307_p2, %p306_p1 }
   0x9   :  { %p309_p4 = pnand %p308_p3, %p302_p0 }
   0xb   :  { %312 = shalt.err (!%p309_p4)
}
   0xc   :  { %30 = dma.hbm_to_vmem [thread:$0]  %s443_s1, 128, %s28_s13, [#allocation10]  }
   0xd   :  { %s321_s19 = scalar_lea.vmem %s18_s15, 128  ;;  %p326_p6 = scmp.lt.s32.totalorder %s18_s15, %s18_s15 }
   0xe   :  { %p322_p5 = scmp.ne.s32.totalorder %s18_s15, %s321_s19  ;;  %p327_p7 = scmp.lt.s32.totalorder %s321_s19, %s321_s19 }
  0x10   :  { %p328_p8 = por %p327_p7, %p326_p6 }
  0x12   :  { %p329_p9 = pnand %p328_p8, %p322_p5 }
  0x14   :  { %332 = shalt.err (!%p329_p9)
}
  0x15   :  { %20 = dma.hbm_to_vmem [thread:$0]  %s442_s0, 128, %s18_s15, [#allocation7]  }
  0x16   :  { %s381_s22 = smov [#allocation11]  }
  0x17   :  { %s37_s23 = sshll.u32 %s381_s22, 4  ;;  %s38_s23 = int_to_ptr.vmem [resolvable:$true] %s37_s23 }
  0x18   :  { %s341_s24 = scalar_lea.vmem %s38_s23, 128  ;;  %p346_p11 = scmp.lt.s32.totalorder %s38_s23, %s38_s23 }
  0x19   :  { %p342_p10 = scmp.ne.s32.totalorder %s38_s23, %s341_s24  ;;  %p347_p12 = scmp.lt.s32.totalorder %s341_s24, %s341_s24 }
  0x1b   :  { %p348_p13 = por %p347_p12, %p346_p11 }
  0x1d   :  { %p349_p0 = pnand %p348_p13, %p342_p10 }
  0x1f   :  { %352 = shalt.err (!%p349_p0)
}
  0x20   :  { %40 = dma.hbm_to_vmem [thread:$0]  %s444_s2, 128, %s38_s23, [#allocation10]  }
  0x21   :  { %373 = dma.done.wait [#allocation7], 128  }
  0x22   :  { %374 = vsyncadd [#allocation7], 4294967168 }
  0x23   :  { %375 = dma.done.wait [#allocation10], 256  }
  0x24   :  { %376 = vsyncadd [#allocation10], 4294967040  ;;  %v61_v0 = vld [vmem:[#allocation11] sm:$0xff]  ;;  %vm63_vm0 = vcmask 261120   ;;  %v59_v1 = vld [vmem:[#allocation6] sm:$0xff]  ;;  %vm126_vm1 = vcmask 7168  }
  0x25   :  { %v60_v2 = vld [vmem:[#allocation9] sm:$0xff]  ;;  %v71_v3 = vmul.f32 %v61_v0, %v61_v0  ;;  %v62_v4 = vmul.f32 %v59_v1, %v59_v1  ;;  %v79_v10 = vmul.f32 %v61_v0, %v59_v1  ;;  %v382_v30 = vmov 0.0   ;;  %s384_s28 = smov [#allocation12]  }
  0x26   :  { %v67_v5 = vmul.f32 %v60_v2, %v60_v2  ;;  %v75_v6 = vmul.f32 %v60_v2, %v59_v1  ;;  %vm54_vm9 = vcmask 0   ;;  %v383_v54 = vmov 0   ;;  %s251_s29 = sshll.u32 %s384_s28, 4  ;;  %s252_s29 = int_to_ptr.vmem [resolvable:$true] %s251_s29 }
  0x27   :  { %v72_v7 = vsel %vm63_vm0, %v71_v3, 0.0  ;;  %v64_v8 = vsel %vm63_vm0, %v62_v4, 0.0  ;;  %v80_v12 = vsel %vm63_vm0, %v79_v10, 0.0  ;;  %55 = vst.msk [vmem:[#allocation2] sm:$0x1] %vm54_vm9, %v382_v30  ;;  %282 = vset.pattern.permute.xlu0 %v383_v54  ;;  %281 = vset.pattern.permute.xlu1 %v383_v54  ;;  %s353_s30 = scalar_lea.vmem %s252_s29, 128  ;;  %p358_p2 = scmp.lt.s32.totalorder %s252_s29, %s252_s29 }
  0x28   :  { %73 = vadd.xlane.f32.xlu1 %v72_v7  ;;  %65 = vadd.xlane.f32.xlu0 %v64_v8  ;;  %v68_v9 = vsel %vm63_vm0, %v67_v5, 0.0  ;;  %v76_v11 = vsel %vm63_vm0, %v75_v6, 0.0  ;;  %56 = vst.msk [vmem:[#allocation3] sm:$0x1] %vm54_vm9, %v382_v30  ;;  %57 = vst.msk [vmem:[#allocation4] sm:$0x1] %vm54_vm9, %v382_v30  ;;  %p354_p1 = scmp.ne.s32.totalorder %s252_s29, %s353_s30  ;;  %p359_p3 = scmp.lt.s32.totalorder %s353_s30, %s353_s30 }
  0x29   :  { %58 = vst.msk [vmem:[#allocation5] sm:$0x1] %vm54_vm9, %v382_v30 }
  0x2a   :  { %p360_p4 = por %p359_p3, %p358_p2 }
  0x2c   :  { %69 = vadd.xlane.f32.xlu0 %v68_v9  ;;  %77 = vadd.xlane.f32.xlu1 %v76_v11  ;;  %p361_p5 = pnand %p360_p4, %p354_p1 }
  0x30   :  { %81 = vadd.xlane.f32.xlu0 %v80_v12 }
  0xb1   :  { %v74_v13 = vpop.xlane.xlu1 %73  ;;  %v66_v14 = vpop.xlane.xlu0 %65 }
  0xb2   :  { %v87_v15 = vmax.f32 %v74_v13, 1e-24  ;;  %v83_v16 = vmax.f32 %v66_v14, 1e-24 }
  0xb4   :  { %283 = vrsqrt.f32 %v87_v15 }
  0xb5   :  { %285 = vrsqrt.f32 %v83_v16  ;;  %v70_v17 = vpop.xlane.xlu0 %69  ;;  %v78_v24 = vpop.xlane.xlu1 %77 }
  0xb6   :  { %v85_v18 = vmax.f32 %v70_v17, 1e-24 }
  0xb8   :  { %287 = vrsqrt.f32 %v85_v18 }
  0xb9   :  { %v82_v22 = vpop.xlane.xlu0 %81 }
  0xc1   :  { %v284_v19 = vpop.eup %283 }
  0xc2   :  { %v286_v20 = vpop.eup %285 }
  0xc3   :  { %v91_v21 = vmul.f32 %v286_v20, %v284_v19  ;;  %v124_v19 = vld [vmem:[#allocation2] sm:$0x1] }
  0xc5   :  { %v288_v23 = vpop.eup %287  ;;  %v92_v25 = vmul.f32 %v91_v21, %v82_v22 }
  0xc6   :  { %v89_v26 = vmul.f32 %v288_v23, %v286_v20  ;;  %v141_v20 = vld [vmem:[#allocation3] sm:$0x1] }
  0xc7   :  { %vm100_vm3 = vcmp.gt.f32.partialorder %v92_v25, 0.8  ;;  %vm104_vm6 = vcmp.le.f32.partialorder %v92_v25, 0.8 }
  0xc8   :  { %v90_v27 = vmul.f32 %v89_v26, %v78_v24 }
  0xca   :  { %v107_v28 = vsub.f32 %v92_v25, %v90_v27  ;;  %vm99_vm2 = vcmp.gt.f32.partialorder %v92_v25, %v90_v27  ;;  %vm103_vm4 = vcmp.le.f32.partialorder %v92_v25, %v90_v27  ;;  %v157_v27 = vld [vmem:[#allocation4] sm:$0x1] }
  0xcb   :  { %vm101_vm5 = vmor %vm99_vm2, %vm100_vm3 }
  0xcc   :  { %v108_v29 = vmul.f32 10.0, %v107_v28  ;;  %v261_v31 = vsel %vm101_vm5, 1.0, %v382_v30  ;;  %v125_v32 = vsel %vm101_vm5, %v92_v25, 0.0  ;;  %vm419_vm7 = vmand %vm103_vm4, %vm104_vm6  ;;  %v172_v28 = vld [vmem:[#allocation5] sm:$0x1] }
  0xcd   :  { %v144_v34 = vsel %vm126_vm1, %v261_v31, 0.0  ;;  %v127_v35 = vsel %vm126_vm1, %v125_v32, 0.0  ;;  %v262_v37 = vsel %vm419_vm7, 1.0, %v382_v30 }
  0xce   :  { %v110_v36 = vand.u32 2147483647, %v108_v29  ;;  %145 = vadd.xlane.f32.xlu0 %v144_v34  ;;  %128 = vadd.xlane.f32.xlu1 %v127_v35  ;;  %v175_v39 = vsel %vm126_vm1, %v262_v37, 0.0  ;;  %v109_v49 = vmax.f32 %v108_v29, 0.0  ;;  %v191_v35 = vlaneseq }
  0xd0   :  { %v111_v38 = vsub.f32 0.0, %v110_v36  ;;  %v192_v36 = vand.u32 127, %v191_v35 }
  0xd2   :  { %v112_v40 = vmul.f32 1.442695, %v111_v38  ;;  %176 = vadd.xlane.f32.xlu0 %v175_v39  ;;  %vm205_vm10 = vcmp.eq.s32.totalorder %v192_v36, 1  ;;  %vm193_vm11 = vcmp.eq.s32.totalorder %v192_v36, 0  ;;  %vm218_vm12 = vcmp.eq.s32.totalorder %v192_v36, 2 }
  0xd3   :  { %vm231_vm13 = vcmp.eq.s32.totalorder %v192_v36, 3 }
  0xd4   :  { %289 = vpow2.f32 %v112_v40 }
  0xe1   :  { %v290_v41 = vpop.eup %289 }
  0xe2   :  { %v114_v42 = vadd.f32 1.0, %v290_v41  ;;  %v117_v43 = vmul.f32 -0.5, %v290_v41  ;;  %v120_v45 = vand.u32 2147483647, %v290_v41 }
  0xe4   :  { %291 = vlog2.f32 %v114_v42  ;;  %v118_v44 = vadd.f32 1.0, %v117_v43  ;;  %vm121_vm8 = vcmp.lt.f32.partialorder %v120_v45, 0.0004427343 }
  0xe6   :  { %v119_v48 = vmul.f32 %v290_v41, %v118_v44 }
  0xf1   :  { %v292_v46 = vpop.eup %291 }
  0xf2   :  { %v116_v47 = vmul.f32 0.6931472, %v292_v46 }
  0xf4   :  { %v122_v50 = vsel %vm121_vm8, %v119_v48, %v116_v47 }
  0xf5   :  { %v123_v51 = vadd.f32 %v122_v50, %v109_v49 }
  0xf7   :  { %v158_v52 = vsel %vm419_vm7, %v123_v51, 0.0 }
  0xf8   :  { %v159_v53 = vsel %vm126_vm1, %v158_v52, 0.0 }
  0xf9   :  { %160 = vadd.xlane.f32.xlu1 %v159_v53 }
 0x157   :  { %v146_v55 = vpop.xlane.xlu0 %145  ;;  %v129_v56 = vpop.xlane.xlu1 %128 }
 0x158   :  { %v147_v57 = vrot.slane %v146_v55, 4  ;;  %v130_v58 = vrot.slane %v129_v56, 4 }
 0x15a   :  { %v148_v59 = vadd.f32 %v147_v57, %v146_v55  ;;  %v131_v60 = vadd.f32 %v130_v58, %v129_v56 }
 0x15b   :  { %v177_v5 = vpop.xlane.xlu0 %176 }
 0x15c   :  { %v149_v61 = vrot.slane %v148_v59, 2  ;;  %v132_v62 = vrot.slane %v131_v60, 2  ;;  %v178_v6 = vrot.slane %v177_v5, 4 }
 0x15e   :  { %v133_v63 = vadd.f32 %v132_v62, %v131_v60  ;;  %v150_v0 = vadd.f32 %v149_v61, %v148_v59  ;;  %v179_v7 = vadd.f32 %v178_v6, %v177_v5 }
 0x160   :  { %v134_v1 = vrot.slane %v133_v63, 1  ;;  %v151_v2 = vrot.slane %v150_v0, 1  ;;  %v180_v8 = vrot.slane %v179_v7, 2 }
 0x162   :  { %v135_v3 = vadd.f32 %v134_v1, %v133_v63  ;;  %v152_v4 = vadd.f32 %v151_v2, %v150_v0  ;;  %v181_v12 = vadd.f32 %v180_v8, %v179_v7 }
 0x164   :  { %267 = vpush %v135_v3  ;;  %v182_v15 = vrot.slane %v181_v12, 1 }
 0x165   :  { %269 = vpush %v152_v4 }
 0x166   :  { %v183_v18 = vadd.f32 %v182_v15, %v181_v12 }
 0x182   :  { %v161_v9 = vpop.xlane.xlu1 %160 }
 0x183   :  { %v162_v10 = vrot.slane %v161_v9, 4 }
 0x185   :  { %v163_v11 = vadd.f32 %v162_v10, %v161_v9 }
 0x187   :  { %v164_v13 = vrot.slane %v163_v11, 2 }
 0x189   :  { %v165_v14 = vadd.f32 %v164_v13, %v163_v11 }
 0x18b   :  { %v166_v16 = vrot.slane %v165_v14, 1 }
 0x18d   :  { %v167_v17 = vadd.f32 %v166_v16, %v165_v14 }
 0x18f   :  { %271 = vpush %v167_v17 }
 0x190   :  { %273 = vpush %v183_v18 }
 0x195   :  { %s268_s0 = spop %267 }
 0x196   :  { %v137_v21 = vstv %s268_s0  ;;  %s270_s2 = spop %269 }
 0x197   :  { %v138_v22 = vadd.f32 %v137_v21, %v124_v19  ;;  %v154_v23 = vstv %s270_s2 }
 0x198   :  { %v155_v24 = vadd.f32 %v154_v23, %v141_v20 }
 0x199   :  { %140 = vst.msk [vmem:[#allocation2] sm:$0x1] %vm54_vm9, %v138_v22 }
 0x19a   :  { %156 = vst.msk [vmem:[#allocation3] sm:$0x1] %vm54_vm9, %v155_v24 }
 0x1a0   :  { %v263_v25 = vld [vmem:[#allocation2] ss:$0 sm:$0xff] }
 0x1a1   :  { %v264_v26 = vld [vmem:[#allocation3] ss:$0 sm:$0xff]  ;;  %201 = vperm.xlu1 %281, %v263_v25  }
 0x1a2   :  { %213 = vperm.xlu0 %282, %v264_v26  }
 0x1c0   :  { %s272_s26 = spop %271 }
 0x1c1   :  { %v169_v29 = vstv %s272_s26  ;;  %s274_s27 = spop %273 }
 0x1c2   :  { %v170_v30 = vadd.f32 %v169_v29, %v157_v27  ;;  %v185_v31 = vstv %s274_s27 }
 0x1c3   :  { %v186_v32 = vadd.f32 %v185_v31, %v172_v28 }
 0x1c4   :  { %171 = vst.msk [vmem:[#allocation4] sm:$0x1] %vm54_vm9, %v170_v30 }
 0x1c5   :  { %187 = vst.msk [vmem:[#allocation5] sm:$0x1] %vm54_vm9, %v186_v32 }
 0x1cb   :  { %v265_v33 = vld [vmem:[#allocation4] ss:$0 sm:$0xff] }
 0x1cc   :  { %226 = vperm.xlu1 %281, %v265_v33   ;;  %v266_v34 = vld [vmem:[#allocation5] ss:$0 sm:$0xff] }
 0x1d0   :  { %239 = vperm.xlu1 %281, %v266_v34  }
 0x21c   :  { %v202_v38 = vpop.permute.xlu1 %201 }
 0x21d   :  { %v214_v37 = vpop.permute.xlu0 %213  ;;  %v204_v40 = vsel %vm193_vm11, %v202_v38, 0.0 }
 0x21e   :  { %v216_v39 = vsel %vm205_vm10, %v214_v37, 0.0 }
 0x21f   :  { %v217_v43 = vadd.f32 %v216_v39, %v204_v40 }
 0x247   :  { %v227_v41 = vpop.permute.xlu1 %226 }
 0x248   :  { %v229_v42 = vsel %vm218_vm12, %v227_v41, 0.0 }
 0x249   :  { %v230_v44 = vadd.f32 %v229_v42, %v217_v43 }
 0x24b   :  { %v240_v45 = vpop.permute.xlu1 %239 }
 0x24c   :  { %v242_v46 = vsel %vm231_vm13, %v240_v45, 0.0 }
 0x24d   :  { %v243_v47 = vadd.f32 %v242_v46, %v230_v44 }
 0x24f   :  { %244 = vst [vmem:[#allocation12] sm:$0xff] %v243_v47 }
 0x250   :  { %364 = shalt.err (!%p361_p5)
}
 0x251   :  { %254 = dma.vmem_to_hbm [thread:$0]  %s252_s29, 128, %s445_s3, [#allocation8]  }
 0x252   :  { %377 = dma.done.wait [#allocation8], 128  }
 0x253   :  { %378 = vsyncadd [#allocation8], 4294967168 }
 0x254   :  { %258 = vsyncpa [#allocation7], 1 }
 0x255   :  { %259 = vsyncpa [#allocation10], 1 }
 0x256   :  { %260 = vsyncpa [#allocation8], 1 }

</bundles_post_ra>
